<compile_context>
chip_gen: v7x
topology: tpu7x:2x2x1
jax: 0.10.0
libtpu: 0.0.40
codegen_flags: <defaults>
</compile_context>

<pallas_src>
import math

import jax
import jax.numpy as jnp
from jax.experimental import pallas as pl
from jax.experimental.pallas import tpu as pltpu


# ---------------------------------------------------------------------------
# Buffer setup (mirrors the PyTorch __init__; plain JAX, not the hot path).
# ---------------------------------------------------------------------------
def _make_pe(d_model: int, max_seq_length: int) -> jnp.ndarray:
    """Sinusoidal positional-encoding buffer (max_seq_length, d_model), f32."""
    position = jnp.arange(0, max_seq_length, dtype=jnp.float32)[:, None]        # (S, 1)
    div_term = jnp.exp(
        jnp.arange(0, d_model, 2, dtype=jnp.float32) * -(math.log(10000.0) / d_model)
    )                                                                            # (ceil(D/2),)
    angles = position * div_term                                                 # (S, ceil(D/2))
    pe = jnp.zeros((max_seq_length, d_model), dtype=jnp.float32)
    pe = pe.at[:, 0::2].set(jnp.sin(angles))
    pe = pe.at[:, 1::2].set(jnp.cos(angles)[:, : d_model // 2])                  # odd-D safe
    return pe


# ---------------------------------------------------------------------------
# Kernel: elementwise add on lane-dense (rows, cols) tiles.
#   x block: (TB, TC), pe block: (1, TC) -> broadcast over the sublane axis.
# ---------------------------------------------------------------------------
def _pe_add_kernel(x_ref, pe_ref, o_ref):
    o_ref[...] = x_ref[...] + pe_ref[...]


def _tpu_budgets():
    """(max_block_bytes, vmem_limit_bytes), gated by TPU generation."""
    try:
        info = pltpu.get_tpu_info()
        vmem = None
        for attr in ("vmem_capacity_bytes", "vmem_size_bytes", "vmem_bytes"):
            vmem = getattr(info, attr, None)
            if vmem is not None:
                break
        if vmem is not None:
            if vmem >= 100 * 1024 * 1024:
                # v5e / v6e: 128 MiB physical VMEM -> bigger blocks, fewer steps.
                return 8 * 1024 * 1024, 64 * 1024 * 1024
            # v7x: 64 MiB physical VMEM -> keep double-buffered footprint < 32 MiB.
            return 6 * 1024 * 1024, 32 * 1024 * 1024
    except Exception:
        pass
    # Unknown hardware: conservative defaults that fit every generation.
    return 4 * 1024 * 1024, 32 * 1024 * 1024


def _choose_tiles(b: int, n: int, itemsize: int, max_block_bytes: int):
    """Pick (row_tile, col_tile) for the flattened (B, N=S*D) layout."""
    # Dtype-aware sublane packing: 8 rows for f32, 16 for bf16, 32 for int8/fp8.
    packing = 8 * max(1, 4 // max(1, itemsize))
    tb = packing if b >= packing else b          # full-extent rows are always legal
    # Largest multiple of 128 columns that keeps one block under the budget.
    cap = max(128, (max_block_bytes // (itemsize * tb)) // 128 * 128)
    tc = min(n, cap)
    return tb, tc


def _pe_add(x2: jnp.ndarray, pe2: jnp.ndarray) -> jnp.ndarray:
    """x2: (B, N) lane-dense activations;  pe2: (1, N) positional encoding."""
    b, n = x2.shape
    itemsize = jnp.dtype(x2.dtype).itemsize
    max_block_bytes, vmem_limit = _tpu_budgets()

    # Keep the lane axis a multiple of 128 (pad + slice back) so every block is
    # lane-dense and bounded by the VMEM budget even for odd D / awkward S*D.
    n_pad = ((n + 127) // 128) * 128
    if n_pad != n:
        x2 = jnp.pad(x2, ((0, 0), (0, n_pad - n)))
        pe2 = jnp.pad(pe2, ((0, 0), (0, n_pad - n)))

    tb, tc = _choose_tiles(b, n_pad, itemsize, max_block_bytes)
    # Columns outer, rows inner: pe's block index is constant across the inner
    # axis -> fetched once per column tile; the outer axis shards across cores.
    grid = (pl.cdiv(n_pad, tc), pl.cdiv(b, tb))

    out2 = pl.pallas_call(
        _pe_add_kernel,
        out_shape=jax.ShapeDtypeStruct((b, n_pad), x2.dtype),
        grid=grid,
        in_specs=[
            pl.BlockSpec((tb, tc), lambda j, i: (i, j)),   # x tile
            pl.BlockSpec((1, tc), lambda j, i: (0, j)),    # pe tile (resident over rows)
        ],
        out_specs=pl.BlockSpec((tb, tc), lambda j, i: (i, j)),
        compiler_params=pltpu.CompilerParams(
            dimension_semantics=("parallel", "parallel"),
            vmem_limit_bytes=vmem_limit,
        ),
    )(x2, pe2)

    if n_pad != n:
        out2 = out2[:, :n]
    return out2


# ---------------------------------------------------------------------------
# Module-like wrapper (mirrors PositionalEncoding.__init__ / forward).
# ---------------------------------------------------------------------------
class PositionalEncoding:
    def __init__(self, d_model: int, max_seq_length: int, dtype=jnp.float32):
        self.d_model = d_model
        self.max_seq_length = max_seq_length
        pe = _make_pe(d_model, max_seq_length)                       # (S_max, D) f32
        # Stored pre-flattened & pre-cast: the per-call wrapper then only slices,
        # avoiding a reshape+astype HBM round trip outside the kernel.
        self.pe_flat = pe.reshape(1, max_seq_length * d_model).astype(dtype)
        self.pe = pe                                                  # kept for reference checks

    def __call__(self, x: jnp.ndarray) -> jnp.ndarray:
        b, s, d = x.shape
        assert d == self.d_model and s <= self.max_seq_length
        n = s * d
        x2 = x.reshape(b, n)                                          # lane-dense flatten
        pe2 = jax.lax.slice(self.pe_flat, (0, 0), (1, n))             # first s rows, flattened
        if pe2.dtype != x.dtype:
            pe2 = pe2.astype(x.dtype)
        out2 = _pe_add(x2, pe2)
        return out2.reshape(b, s, d)


if __name__ == "__main__":
    d_model = 32
    max_seq_length = 16
    batch = 2
    seq = 8  # forward only uses the first `seq` rows of pe

    key = jax.random.PRNGKey(0)
    x = jax.random.normal(key, (batch, seq, d_model), dtype=jnp.float32)

    module = PositionalEncoding(d_model, max_seq_length)
    out = module(x)
    out = jax.block_until_ready(out)

    # Reference check (plain JAX) for the forward semantics.
    ref = x + module.pe[None, :seq, :]
    assert out.shape == (batch, seq, d_model)
    assert jnp.allclose(out, ref, atol=1e-6), "mismatch vs reference"

    print("KERNEL_OK")
</pallas_src>

<mosaic_0001>
module attributes {stable_mosaic.version = 11 : i64} {
  func.func @_pe_add_kernel(%arg0: i32, %arg1: i32, %arg2: memref<2x256xf32, #tpu.memory_space<vmem>>, %arg3: memref<1x256xf32, #tpu.memory_space<vmem>>, %arg4: memref<2x256xf32, #tpu.memory_space<vmem>>) attributes {dimension_semantics = [#tpu.dimension_semantics<parallel>, #tpu.dimension_semantics<parallel>], iteration_bounds = array<i64: 1, 1>, scalar_prefetch = 0 : i64, scratch_operands = 0 : i64, tpu.core_type = #tpu.core_type<tc>, window_params = [{transform_indices = @transform_0, window_bounds = array<i64: 2, 256>}, {transform_indices = @transform_1, window_bounds = array<i64: 1, 256>}, {transform_indices = @transform_2, window_bounds = array<i64: 2, 256>}]} {
    %c0 = arith.constant 0 : index
    %c0_0 = arith.constant 0 : index
    %0 = vector.load %arg2[%c0, %c0_0] : memref<2x256xf32, #tpu.memory_space<vmem>>, vector<2x256xf32>
    %c0_1 = arith.constant 0 : index
    %c0_2 = arith.constant 0 : index
    %1 = vector.load %arg3[%c0_1, %c0_2] : memref<1x256xf32, #tpu.memory_space<vmem>>, vector<1x256xf32>
    %2 = vector.broadcast %1 : vector<1x256xf32> to vector<2x256xf32>
    %3 = arith.addf %0, %2 : vector<2x256xf32>
    %c0_3 = arith.constant 0 : index
    %c0_4 = arith.constant 0 : index
    %4 = vector.load %arg4[%c0_3, %c0_4] : memref<2x256xf32, #tpu.memory_space<vmem>>, vector<2x256xf32>
    tpu.vector_store %arg4[%c0_3, %c0_4], %3 {strides = array<i32>} : memref<2x256xf32, #tpu.memory_space<vmem>>, vector<2x256xf32>,
    return
  }
  func.func @transform_0(%arg0: i32, %arg1: i32) -> (i32, i32) {
    %c0_i32 = arith.constant 0 : i32
    return %arg1, %arg0 : i32, i32
  }
  func.func @transform_1(%arg0: i32, %arg1: i32) -> (i32, i32) {
    %c0_i32 = arith.constant 0 : i32
    %c0_i32_0 = arith.constant 0 : i32
    return %c0_i32, %arg0 : i32, i32
  }
  func.func @transform_2(%arg0: i32, %arg1: i32) -> (i32, i32) {
    %c0_i32 = arith.constant 0 : i32
    return %arg1, %arg0 : i32, i32
  }
}

</mosaic_0001>

<bundles_post_ra>
// kernel: tpu_custom_call.1
= control target key start
LH: loop header
LB: loop body
LE: loop exit
PB: predicated region body
PF: predicated region fallthrough
CT: control target
= control target key end

     0   :  { %7 = vsyncpa [#allocation3], 0  ;;  %s157_s0 = inlined_call_operand.hbm [shape: f32[2,256], index: 0, kind: input, shape index: {}]   ;;  %s158_s1 = inlined_call_operand.vmem [shape: f32[1,256], index: 1, kind: input, shape index: {}]   ;;  %s159_s2 = inlined_call_operand.hbm [shape: f32[2,256], index: 2, kind: output, shape index: {}]  }
   0x1   :  { %8 = vsyncpa [#allocation4], 0  ;;  %s112_s9 = smov [#allocation2]   ;;  %s64_s13 = scalar_lea.hbm %s157_s0, 64 }
   0x2   :  { %s15_s10 = sshll.u32 %s112_s9, 4  ;;  %p65_p0 = scmp.ne.s32.totalorder %s157_s0, %s64_s13  ;;  %s16_s10 = int_to_ptr.vmem [resolvable:$true] %s15_s10 }
   0x3   :  { %p68_p1 = scmp.lt.u32.totalorder %s64_s13, %s157_s0 }
   0x5   :  { %p70_p2 = pnand %p68_p1, %p65_p0 }
   0x7   :  { %73 = shalt.err (!%p70_p2)
}
   0x8   :  { %s74_s18 = scalar_lea.vmem %s16_s10, 64  ;;  %p79_p4 = scmp.lt.s32.totalorder %s16_s10, %s16_s10 }
   0x9   :  { %p75_p3 = scmp.ne.s32.totalorder %s16_s10, %s74_s18  ;;  %p80_p5 = scmp.lt.s32.totalorder %s74_s18, %s74_s18 }
   0xb   :  { %p81_p6 = por %p80_p5, %p79_p4 }
   0xd   :  { %p82_p7 = pnand %p81_p6, %p75_p3 }
   0xf   :  { %85 = shalt.err (!%p82_p7)
}
  0x10   :  { %18 = dma.hbm_to_vmem [thread:$0]  %s157_s0, 64, %s16_s10, [#allocation3]  }
  0x11   :  { %108 = dma.done.wait [#allocation3], 64  }
  0x12   :  { %109 = vsyncadd [#allocation3], 4294967232  ;;  %v27_v0 = vlaneseq  ;;  %v113_v1 = vmov 1983009808   ;;  %v25_v7 = vld [vmem:[%s158_s1] sm:$0x3] }
  0x13   :  { %v37_v2 = vunpack.c.l.s4 %v113_v1  ;;  %v24_v12 = vld [vmem:[#allocation2] sm:$0xf]  ;;  %s114_s23 = smov [#allocation5]  }
  0x14   :  { %v28_v3 = vshrl.u32 %v27_v0, 7  ;;  %s52_s0 = sshll.u32 %s114_s23, 4  ;;  %s53_s0 = int_to_ptr.vmem [resolvable:$true] %s52_s0 }
  0x15   :  { %v38_v6 = vunpack.c.0.s8 %v37_v2  ;;  %s86_s24 = scalar_lea.vmem %s53_s0, 64  ;;  %p91_p9 = scmp.lt.s32.totalorder %s53_s0, %s53_s0 }
  0x16   :  { %v29_v4 = vsub.s32 0, %v28_v3  ;;  %v33_v5 = vsub.s32 1, %v28_v3  ;;  %p87_p8 = scmp.ne.s32.totalorder %s53_s0, %s86_s24  ;;  %p92_p10 = scmp.lt.s32.totalorder %s86_s24, %s86_s24 }
  0x17   :  { %v41_v10 = vsub.s32 %v38_v6, %v28_v3 }
  0x18   :  { %v30_v8 = vrot.slane %v25_v7, %v29_v4  ;;  %v34_v9 = vrot.slane %v25_v7, %v33_v5  ;;  %p93_p11 = por %p92_p10, %p91_p9 }
  0x1a   :  { %v35_v11 = vcombine.low %v30_v8, %v34_v9  ;;  %p94_p12 = pnand %p93_p11, %p87_p8 }
  0x1c   :  { %v42_v13 = vrot.slane %v35_v11, %v41_v10 }
  0x1e   :  { %v44_v14 = vadd.f32 %v42_v13, %v24_v12 }
  0x20   :  { %45 = vst [vmem:[#allocation5] sm:$0xf] %v44_v14 }
  0x21   :  { %97 = shalt.err (!%p94_p12)
}
  0x22   :  { %s98_s26 = scalar_lea.hbm %s159_s2, 64 }
  0x23   :  { %p99_p13 = scmp.ne.s32.totalorder %s159_s2, %s98_s26  ;;  %p102_p0 = scmp.lt.u32.totalorder %s98_s26, %s159_s2 }
  0x25   :  { %p104_p1 = pnand %p102_p0, %p99_p13 }
  0x27   :  { %107 = shalt.err (!%p104_p1)
}
  0x28   :  { %55 = dma.vmem_to_hbm [thread:$0]  %s53_s0, 64, %s159_s2, [#allocation4]  }
  0x29   :  { %110 = dma.done.wait [#allocation4], 64  }
  0x2a   :  { %111 = vsyncadd [#allocation4], 4294967232 }
  0x2b   :  { %59 = vsyncpa [#allocation3], 1 }
  0x2c   :  { %60 = vsyncpa [#allocation4], 1 }

</bundles_post_ra>
